<compile_context>
chip_gen: v6e
topology: v6e:2x2x1
jax: 0.10.0
libtpu: 0.0.40
codegen_flags: <defaults>
</compile_context>

<pallas_src>
import jax
import jax.numpy as jnp
from jax.experimental import pallas as pl
from jax.experimental.pallas import tpu as pltpu

EMBED_LEN = 64          # 2^6 probabilities from the 6-wire circuit
PACK = 2                # tokens packed per 128-lane row
LANES = EMBED_LEN * PACK
LN_EPS = 1e-5
# 4096 rows * 128 lanes * 4B = 2 MiB per streaming buffer; with double-buffered
# in+out plus in-kernel VMEM temporaries this stays well inside the 48 MiB
# scoped limit requested below on every generation (v5e/v6e/v7x).
DEFAULT_TILE_M = 4096


def _round_up(v, m):
    return ((v + m - 1) // m) * m


def ffblock_kernel(x_ref, w_ref, segd_ref, segm_ref, gamma_ref, beta_ref, o_ref):
    # x tile: [TILE_M, 128] f32 = two tokens per row (lanes 0..63 and 64..127).
    x = x_ref[...]

    # TODO(synk): the real feed_forward simulates a CV quantum circuit
    # (pennylane / strawberryfields Fock backend) with no Pallas equivalent; a
    # deterministic linear projection + softmax surrogate is used instead so
    # the output is still a length-64 probability vector per token (matches the
    # qml.probs output shape/range); the rest of the block is exact.
    # w_ref is the 128x128 block-diagonal bf16 embedding of the 64x64 surrogate W.
    logits = jnp.dot(x.astype(jnp.bfloat16), w_ref[...],
                     preferred_element_type=jnp.float32)

    # Single shared per-row max: softmax is invariant to any per-row constant
    # shift, and the shift cancels inside each 64-lane segment's sum.
    m = jnp.max(logits, axis=-1, keepdims=True)
    e = jnp.exp(logits - m)

    # Segmented (per 64-lane half) sums via block-diagonal ones matmul (MXU).
    denom = jnp.dot(e.astype(jnp.bfloat16), segd_ref[...],
                    preferred_element_type=jnp.float32)
    probs = e * pl.reciprocal(denom, approx=True)

    # dropout(p=0.1) in eval mode -> identity (deterministic forward).
    # Residual add + LayerNorm over each token's 64 lanes.
    y = probs + x

    # segm is pre-scaled by 1/EMBED_LEN; mean/var dots kept in f32 for accuracy.
    mean = jnp.dot(y, segm_ref[...], preferred_element_type=jnp.float32)
    cent = y - mean
    var = jnp.dot(cent * cent, segm_ref[...], preferred_element_type=jnp.float32)
    inv = jax.lax.rsqrt(var + LN_EPS)
    o_ref[...] = (cent * (inv * gamma_ref[...]) + beta_ref[...]).astype(o_ref.dtype)


def feed_forward_block(x, w, gamma, beta, *, tile_m=DEFAULT_TILE_M):
    """x: [B, S, E] float32, w: [E, E] surrogate weight, gamma/beta: [E]."""
    B, S, E = x.shape
    assert E == EMBED_LEN
    N = B * S
    x2 = x.reshape(N, E)

    # Pack two tokens per 128-lane row. Pad only to a multiple of 16 tokens
    # (8 sublane rows) -- partial trailing grid blocks are masked by Pallas, so
    # no tile_m-sized pad / full-array HBM copy is needed.
    tokens_pad = _round_up(N, PACK * 8)
    if tokens_pad != N:
        x2 = jnp.pad(x2, ((0, tokens_pad - N), (0, 0)))
    rows = tokens_pad // PACK
    xp = x2.reshape(rows, LANES)

    # Keep the grid at >= 2 steps when possible so the "parallel" axis can
    # shard across v7x's 2 TensorCores; tile_m stays a multiple of 8 sublanes.
    tile_m = max(8, min(tile_m, _round_up(pl.cdiv(rows, 2), 8)))
    grid = (pl.cdiv(rows, tile_m),)

    # Block-diagonal surrogate weight (bf16 -> single-pass MXU).
    w = w.astype(jnp.float32)
    wp = jnp.zeros((LANES, LANES), jnp.float32)
    wp = wp.at[:E, :E].set(w).at[E:, E:].set(w).astype(jnp.bfloat16)

    # Block-diagonal segment-sum matrices:
    #   segd (bf16): softmax denominator sums
    #   segm (f32, pre-scaled by 1/E): LayerNorm mean / variance
    ones_e = jnp.ones((E, E), jnp.float32)
    seg = jnp.zeros((LANES, LANES), jnp.float32)
    seg = seg.at[:E, :E].set(ones_e).at[E:, E:].set(ones_e)
    segd = seg.astype(jnp.bfloat16)
    segm = seg * jnp.float32(1.0 / E)

    gamma2 = jnp.concatenate([gamma, gamma]).reshape(1, LANES).astype(jnp.float32)
    beta2 = jnp.concatenate([beta, beta]).reshape(1, LANES).astype(jnp.float32)

    out = pl.pallas_call(
        ffblock_kernel,
        out_shape=jax.ShapeDtypeStruct((rows, LANES), x.dtype),
        grid=grid,
        in_specs=[
            pl.BlockSpec((tile_m, LANES), lambda i: (i, 0)),   # x row tile (streamed)
            pl.BlockSpec((LANES, LANES), lambda i: (0, 0)),    # surrogate W (resident, bf16)
            pl.BlockSpec((LANES, LANES), lambda i: (0, 0)),    # softmax segment sums (bf16)
            pl.BlockSpec((LANES, LANES), lambda i: (0, 0)),    # LN segment means (f32, /E)
            pl.BlockSpec((1, LANES), lambda i: (0, 0)),        # layernorm gamma
            pl.BlockSpec((1, LANES), lambda i: (0, 0)),        # layernorm beta
        ],
        out_specs=pl.BlockSpec((tile_m, LANES), lambda i: (i, 0)),
        compiler_params=pltpu.CompilerParams(
            dimension_semantics=("parallel",),
            vmem_limit_bytes=48 * 1024 * 1024,
        ),
    )(xp, wp, segd, segm, gamma2, beta2)

    out = out.reshape(tokens_pad, E)[:N]
    return out.reshape(B, S, E)


def _reference(x, w, gamma, beta):
    """Pure-JAX reference of the same (surrogate) forward pass."""
    logits = jnp.einsum("bse,ef->bsf", x, w)
    probs = jax.nn.softmax(logits, axis=-1)
    y = probs + x
    mean = jnp.mean(y, axis=-1, keepdims=True)
    var = jnp.mean((y - mean) ** 2, axis=-1, keepdims=True)
    return (y - mean) * jax.lax.rsqrt(var + LN_EPS) * gamma + beta


if __name__ == "__main__":
    key = jax.random.PRNGKey(0)
    k_x, k_w = jax.random.split(key)

    B, S, E = 2, 8, EMBED_LEN
    x = jax.random.normal(k_x, (B, S, E), dtype=jnp.float32)

    # Deterministic parameter init.
    w = jax.random.normal(k_w, (E, E), dtype=jnp.float32) * 0.1  # surrogate feed_forward weight
    gamma = jnp.ones((E,), dtype=jnp.float32)   # nn.LayerNorm default weight
    beta = jnp.zeros((E,), dtype=jnp.float32)   # nn.LayerNorm default bias

    out = feed_forward_block(x, w, gamma, beta)
    jax.block_until_ready(out)

    assert out.shape == (B, S, E)
    assert jnp.all(jnp.isfinite(out))

    ref = _reference(x, w, gamma, beta)
    max_err = float(jnp.max(jnp.abs(out - ref)))
    # bf16 MXU operands + approx reciprocal in softmax -> loose tolerance
    assert max_err < 1e-2, f"max abs err {max_err}"

    print("KERNEL_OK")
</pallas_src>

<mosaic_0001>
module attributes {stable_mosaic.version = 11 : i64} {
  func.func @ffblock_kernel(%arg0: i32, %arg1: memref<8x128xf32, #tpu.memory_space<vmem>>, %arg2: memref<128x128xbf16, #tpu.memory_space<vmem>>, %arg3: memref<128x128xbf16, #tpu.memory_space<vmem>>, %arg4: memref<128x128xf32, #tpu.memory_space<vmem>>, %arg5: memref<1x128xf32, #tpu.memory_space<vmem>>, %arg6: memref<1x128xf32, #tpu.memory_space<vmem>>, %arg7: memref<8x128xf32, #tpu.memory_space<vmem>>) attributes {dimension_semantics = [#tpu.dimension_semantics<parallel>], iteration_bounds = array<i64: 1>, scalar_prefetch = 0 : i64, scratch_operands = 0 : i64, tpu.core_type = #tpu.core_type<tc>, window_params = [{transform_indices = @transform_0, window_bounds = array<i64: 8, 128>}, {pipeline_mode = #tpu.pipeline_mode<synchronous>, transform_indices = @transform_1, window_bounds = array<i64: 128, 128>}, {pipeline_mode = #tpu.pipeline_mode<synchronous>, transform_indices = @transform_2, window_bounds = array<i64: 128, 128>}, {pipeline_mode = #tpu.pipeline_mode<synchronous>, transform_indices = @transform_3, window_bounds = array<i64: 128, 128>}, {pipeline_mode = #tpu.pipeline_mode<synchronous>, transform_indices = @transform_4, window_bounds = array<i64: 1, 128>}, {pipeline_mode = #tpu.pipeline_mode<synchronous>, transform_indices = @transform_5, window_bounds = array<i64: 1, 128>}, {transform_indices = @transform_6, window_bounds = array<i64: 8, 128>}]} {
    %c0 = arith.constant 0 : index
    %c0_0 = arith.constant 0 : index
    %0 = vector.load %arg1[%c0, %c0_0] : memref<8x128xf32, #tpu.memory_space<vmem>>, vector<8x128xf32>
    %1 = arith.truncf %0 : vector<8x128xf32> to vector<8x128xbf16>
    %c0_1 = arith.constant 0 : index
    %c0_2 = arith.constant 0 : index
    %2 = vector.load %arg2[%c0_1, %c0_2] : memref<128x128xbf16, #tpu.memory_space<vmem>>, vector<128x128xbf16>
    %cst = arith.constant dense<0.000000e+00> : vector<8x128xf32>
    %3 = tpu.matmul %1, %2, %cst {dimension_numbers = #tpu.dot_dimension_numbers<[1], [0], [0], [1], [0, 0, 1, 1], [], []>} : vector<8x128xbf16>, vector<128x128xbf16>, vector<8x128xf32> -> vector<8x128xf32>
    %cst_3 = arith.constant dense<0xFF800000> : vector<8xf32>
    %4 = vector.multi_reduction <maximumf>, %3, %cst_3 [1] : vector<8x128xf32> to vector<8xf32>
    %5 = vector.shape_cast %4 : vector<8xf32> to vector<8x1xf32>
    %6 = vector.broadcast %5 : vector<8x1xf32> to vector<8x128xf32>
    %7 = arith.subf %3, %6 : vector<8x128xf32>
    %8 = math.exp %7 : vector<8x128xf32>
    %9 = arith.truncf %8 : vector<8x128xf32> to vector<8x128xbf16>
    %c0_4 = arith.constant 0 : index
    %c0_5 = arith.constant 0 : index
    %10 = vector.load %arg3[%c0_4, %c0_5] : memref<128x128xbf16, #tpu.memory_space<vmem>>, vector<128x128xbf16>
    %cst_6 = arith.constant dense<0.000000e+00> : vector<8x128xf32>
    %11 = tpu.matmul %9, %10, %cst_6 {dimension_numbers = #tpu.dot_dimension_numbers<[1], [0], [0], [1], [0, 0, 1, 1], [], []>} : vector<8x128xbf16>, vector<128x128xbf16>, vector<8x128xf32> -> vector<8x128xf32>
    %12 = tpu.reciprocal %11 {approx = true} : vector<8x128xf32> -> vector<8x128xf32>
    %13 = arith.mulf %8, %12 : vector<8x128xf32>
    %14 = arith.addf %13, %0 : vector<8x128xf32>
    %c0_7 = arith.constant 0 : index
    %c0_8 = arith.constant 0 : index
    %15 = vector.load %arg4[%c0_7, %c0_8] : memref<128x128xf32, #tpu.memory_space<vmem>>, vector<128x128xf32>
    %cst_9 = arith.constant dense<0.000000e+00> : vector<8x128xf32>
    %16 = tpu.matmul %14, %15, %cst_9 {dimension_numbers = #tpu.dot_dimension_numbers<[1], [0], [0], [1], [0, 0, 1, 1], [], []>} : vector<8x128xf32>, vector<128x128xf32>, vector<8x128xf32> -> vector<8x128xf32>
    %17 = arith.subf %14, %16 : vector<8x128xf32>
    %18 = arith.mulf %17, %17 : vector<8x128xf32>
    %c0_10 = arith.constant 0 : index
    %c0_11 = arith.constant 0 : index
    %19 = vector.load %arg4[%c0_10, %c0_11] : memref<128x128xf32, #tpu.memory_space<vmem>>, vector<128x128xf32>
    %cst_12 = arith.constant dense<0.000000e+00> : vector<8x128xf32>
    %20 = tpu.matmul %18, %19, %cst_12 {dimension_numbers = #tpu.dot_dimension_numbers<[1], [0], [0], [1], [0, 0, 1, 1], [], []>} : vector<8x128xf32>, vector<128x128xf32>, vector<8x128xf32> -> vector<8x128xf32>
    %cst_13 = arith.constant 9.99999974E-6 : f32
    %21 = vector.broadcast %cst_13 : f32 to vector<8x128xf32>
    %22 = arith.addf %20, %21 : vector<8x128xf32>
    %23 = math.rsqrt %22 : vector<8x128xf32>
    %c0_14 = arith.constant 0 : index
    %c0_15 = arith.constant 0 : index
    %24 = vector.load %arg5[%c0_14, %c0_15] : memref<1x128xf32, #tpu.memory_space<vmem>>, vector<1x128xf32>
    %25 = vector.broadcast %24 : vector<1x128xf32> to vector<8x128xf32>
    %26 = arith.mulf %23, %25 : vector<8x128xf32>
    %27 = arith.mulf %17, %26 : vector<8x128xf32>
    %c0_16 = arith.constant 0 : index
    %c0_17 = arith.constant 0 : index
    %28 = vector.load %arg6[%c0_16, %c0_17] : memref<1x128xf32, #tpu.memory_space<vmem>>, vector<1x128xf32>
    %29 = vector.broadcast %28 : vector<1x128xf32> to vector<8x128xf32>
    %30 = arith.addf %27, %29 : vector<8x128xf32>
    %c0_18 = arith.constant 0 : index
    %c0_19 = arith.constant 0 : index
    %31 = vector.load %arg7[%c0_18, %c0_19] : memref<8x128xf32, #tpu.memory_space<vmem>>, vector<8x128xf32>
    tpu.vector_store %arg7[%c0_18, %c0_19], %30 {strides = array<i32>} : memref<8x128xf32, #tpu.memory_space<vmem>>, vector<8x128xf32>,
    return
  }
  func.func @transform_0(%arg0: i32) -> (i32, i32) {
    %c0_i32 = arith.constant 0 : i32
    %c0_i32_0 = arith.constant 0 : i32
    return %arg0, %c0_i32 : i32, i32
  }
  func.func @transform_1(%arg0: i32) -> (i32, i32) {
    %c0_i32 = arith.constant 0 : i32
    %c0_i32_0 = arith.constant 0 : i32
    %c0_i32_1 = arith.constant 0 : i32
    return %c0_i32, %c0_i32_0 : i32, i32
  }
  func.func @transform_2(%arg0: i32) -> (i32, i32) {
    %c0_i32 = arith.constant 0 : i32
    %c0_i32_0 = arith.constant 0 : i32
    %c0_i32_1 = arith.constant 0 : i32
    return %c0_i32, %c0_i32_0 : i32, i32
  }
  func.func @transform_3(%arg0: i32) -> (i32, i32) {
    %c0_i32 = arith.constant 0 : i32
    %c0_i32_0 = arith.constant 0 : i32
    %c0_i32_1 = arith.constant 0 : i32
    return %c0_i32, %c0_i32_0 : i32, i32
  }
  func.func @transform_4(%arg0: i32) -> (i32, i32) {
    %c0_i32 = arith.constant 0 : i32
    %c0_i32_0 = arith.constant 0 : i32
    %c0_i32_1 = arith.constant 0 : i32
    return %c0_i32, %c0_i32_0 : i32, i32
  }
  func.func @transform_5(%arg0: i32) -> (i32, i32) {
    %c0_i32 = arith.constant 0 : i32
    %c0_i32_0 = arith.constant 0 : i32
    %c0_i32_1 = arith.constant 0 : i32
    return %c0_i32, %c0_i32_0 : i32, i32
  }
  func.func @transform_6(%arg0: i32) -> (i32, i32) {
    %c0_i32 = arith.constant 0 : i32
    %c0_i32_0 = arith.constant 0 : i32
    return %arg0, %c0_i32 : i32, i32
  }
}

</mosaic_0001>

<bundles_post_ra>
// kernel: tpu_custom_call.1
= control target key start
LH: loop header
LB: loop body
LE: loop exit
PB: predicated region body
PF: predicated region fallthrough
CT: control target
= control target key end

     0   :  { %11 = vsyncpa [#allocation3], 0  ;;  %s945_s0 = inlined_call_operand.hbm [shape: f32[8,128], index: 0, kind: input, shape index: {}]   ;;  %s946_s1 = inlined_call_operand.hbm [shape: bf16[128,128], index: 1, kind: input, shape index: {}]   ;;  %s947_s2 = inlined_call_operand.hbm [shape: bf16[128,128], index: 2, kind: input, shape index: {}]   ;;  %s948_s3 = inlined_call_operand.hbm [shape: f32[128,128], index: 3, kind: input, shape index: {}]   ;;  %s949_s4 = inlined_call_operand.vmem [shape: f32[1,128], index: 4, kind: input, shape index: {}]   ;;  %s950_s5 = inlined_call_operand.vmem [shape: f32[1,128], index: 5, kind: input, shape index: {}]   ;;  %s951_s6 = inlined_call_operand.hbm [shape: f32[8,128], index: 6, kind: output, shape index: {}]  }
   0x1   :  { %12 = vsyncpa [#allocation6], 0 }
   0x2   :  { %13 = vsyncpa [#allocation9], 0 }
   0x3   :  { %14 = vsyncpa [#allocation4], 0  ;;  %s812_s21 = smov [#allocation5]  }
   0x4   :  { %s30_s22 = sshll.u32 %s812_s21, 4  ;;  %s31_s22 = int_to_ptr.vmem [resolvable:$true] %s30_s22 }
   0x5   :  { %s712_s23 = scalar_lea.vmem %s31_s22, 1024  ;;  %p717_p1 = scmp.lt.s32.totalorder %s31_s22, %s31_s22 }
   0x6   :  { %p713_p0 = scmp.ne.s32.totalorder %s31_s22, %s712_s23  ;;  %p718_p2 = scmp.lt.s32.totalorder %s712_s23, %s712_s23 }
   0x8   :  { %p719_p3 = por %p718_p2, %p717_p1 }
   0xa   :  { %p720_p4 = pnand %p719_p3, %p713_p0 }
   0xc   :  { %723 = shalt.err (!%p720_p4)
}
   0xd   :  { %s813_s24 = smov 64   ;;  %s814_s25 = smov 4  }
   0xe   :  { %36 = dma.hbm_to_vmem [thread:$0]  %s946_s1, 1024, %s31_s22, [#allocation6], %s813_s24, %s813_s24, %s814_s25  }
   0xf   :  { %s815_s28 = smov [#allocation2]   ;;  %s816_s30 = smov [#allocation7]  }
  0x10   :  { %s21_s29 = sshll.u32 %s815_s28, 4  ;;  %s42_s7 = sshll.u32 %s816_s30, 4  ;;  %s22_s29 = int_to_ptr.vmem [resolvable:$true] %s21_s29  ;;  %s43_s7 = int_to_ptr.vmem [resolvable:$true] %s42_s7 }
  0x11   :  { %s732_s8 = scalar_lea.vmem %s22_s29, 128  ;;  %p737_p6 = scmp.lt.s32.totalorder %s22_s29, %s22_s29 }
  0x12   :  { %p733_p5 = scmp.ne.s32.totalorder %s22_s29, %s732_s8  ;;  %p738_p7 = scmp.lt.s32.totalorder %s732_s8, %s732_s8 }
  0x14   :  { %p739_p8 = por %p738_p7, %p737_p6 }
  0x16   :  { %p740_p9 = pnand %p739_p8, %p733_p5 }
  0x18   :  { %743 = shalt.err (!%p740_p9)
}
  0x19   :  { %24 = dma.hbm_to_vmem [thread:$0]  %s945_s0, 128, %s22_s29, [#allocation3]  }
  0x1a   :  { %s752_s11 = scalar_lea.vmem %s43_s7, 1024  ;;  %p757_p11 = scmp.lt.s32.totalorder %s43_s7, %s43_s7 }
  0x1b   :  { %p753_p10 = scmp.ne.s32.totalorder %s43_s7, %s752_s11  ;;  %p758_p12 = scmp.lt.s32.totalorder %s752_s11, %s752_s11 }
  0x1d   :  { %p759_p13 = por %p758_p12, %p757_p11 }
  0x1f   :  { %p760_p0 = pnand %p759_p13, %p753_p10 }
  0x21   :  { %763 = shalt.err (!%p760_p0)
}
  0x22   :  { %48 = dma.hbm_to_vmem [thread:$0]  %s947_s2, 1024, %s43_s7, [#allocation6], %s813_s24, %s813_s24, %s814_s25  }
  0x23   :  { %s817_s13 = smov [#allocation8]  }
  0x24   :  { %s54_s14 = sshll.u32 %s817_s13, 4  ;;  %s55_s14 = int_to_ptr.vmem [resolvable:$true] %s54_s14 }
  0x25   :  { %s772_s15 = scalar_lea.vmem %s55_s14, 2048  ;;  %p777_p2 = scmp.lt.s32.totalorder %s55_s14, %s55_s14 }
  0x26   :  { %p773_p1 = scmp.ne.s32.totalorder %s55_s14, %s772_s15  ;;  %p778_p3 = scmp.lt.s32.totalorder %s772_s15, %s772_s15 }
  0x28   :  { %p779_p4 = por %p778_p3, %p777_p2 }
  0x2a   :  { %p780_p5 = pnand %p779_p4, %p773_p1 }
  0x2c   :  { %783 = shalt.err (!%p780_p5)
}
  0x2d   :  { %s818_s0 = smov 128   ;;  %s819_s16 = smov 8  }
  0x2e   :  { %60 = dma.hbm_to_vmem [thread:$0]  %s948_s3, 2048, %s55_s14, [#allocation9], %s818_s0, %s818_s0, %s819_s16  }
  0x2f   :  { %804 = dma.done.wait [#allocation3], 128  }
  0x30   :  { %805 = vsyncadd [#allocation3], 4294967168 }
  0x31   :  { %806 = dma.done.wait [#allocation6], 2048  }
  0x32   :  { %807 = vsyncadd [#allocation6], 4294965248 }
  0x33   :  { %808 = dma.done.wait [#allocation9], 2048  }
  0x34   :  { %809 = vsyncadd [#allocation9], 4294965248  ;;  %v820_v0 = vmov 0.0   ;;  %vm821_vm0 = vmmov 0   ;;  %v682_v1 = vld [vmem:[#allocation5 + $0x38] sm:$0xff]   ;;  %v683_v2 = vld [vmem:[#allocation5 + $0x30] sm:$0xff]  }
  0x35   :  { %561 = vmatprep.subr.bf16.mxu0 %v820_v0  ;;  %577 = vmatprep.mubr.msk.bf16.mxu0 %vm821_vm0, %v820_v0  ;;  %v684_v3 = vld [vmem:[#allocation5 + $0x28] sm:$0xff]   ;;  %v685_v4 = vld [vmem:[#allocation5 + $0x20] sm:$0xff]   ;;  %v686_v5 = vld [vmem:[#allocation5 + $0x18] sm:$0xff]   ;;  %s822_s21 = smov [#allocation10]  }
  0x36   :  { %581 = vmatprep.subr.bf16.mxu1 %v820_v0  ;;  %597 = vmatprep.mubr.msk.bf16.mxu1 %vm821_vm0, %v820_v0  ;;  %v687_v6 = vld [vmem:[#allocation5 + $0x10] sm:$0xff]   ;;  %v688_v7 = vld [vmem:[#allocation5 + $0x8] sm:$0xff]   ;;  %v689_v8 = vld [vmem:[#allocation5] sm:$0xff]   ;;  %s480_s22 = sshll.u32 %s822_s21, 4  ;;  %s481_s22 = int_to_ptr.vmem [resolvable:$true] %s480_s22 }
  0x37   :  { %562 = vmatpush3.bf16.msra.mxu0 %v682_v1  ;;  %v882_v9 = vld [vmem:[#allocation2] sm:$0xff]  ;;  %v691_v12 = vld [vmem:[#allocation7 + $0x30] sm:$0xff]   ;;  %v692_v13 = vld [vmem:[#allocation7 + $0x28] sm:$0xff]   ;;  %s784_s23 = scalar_lea.vmem %s481_s22, 128  ;;  %p789_p7 = scmp.lt.s32.totalorder %s481_s22, %s481_s22 }
  0x38   :  { %563 = vmatprep.subr.bf16.mxu0 %v820_v0  ;;  %v79_v10 = vpack.c.bf16 %v882_v9, %v882_v9  ;;  %v690_v11 = vld [vmem:[#allocation7 + $0x38] sm:$0xff]   ;;  %v693_v18 = vld [vmem:[#allocation7 + $0x20] sm:$0xff]   ;;  %v695_v20 = vld [vmem:[#allocation7 + $0x10] sm:$0xff]   ;;  %p785_p6 = scmp.ne.s32.totalorder %s481_s22, %s784_s23  ;;  %p790_p8 = scmp.lt.s32.totalorder %s784_s23, %s784_s23 }
  0x39   :  { %582 = vmatpush3.bf16.msra.mxu1 %v690_v11  ;;  %v694_v19 = vld [vmem:[#allocation7 + $0x18] sm:$0xff]   ;;  %v696_v21 = vld [vmem:[#allocation7 + $0x8] sm:$0xff]   ;;  %v697_v22 = vld [vmem:[#allocation7] sm:$0xff]  }
  0x3a   :  { %583 = vmatprep.subr.bf16.mxu1 %v820_v0  ;;  %v312_v23 = vld [vmem:[#allocation8 + $0x78] sm:$0xff]  ;;  %v311_v24 = vld [vmem:[#allocation8 + $0x70] sm:$0xff]  ;;  %v310_v25 = vld [vmem:[#allocation8 + $0x68] sm:$0xff]  ;;  %p791_p9 = por %p790_p8, %p789_p7 }
  0x3b   :  { %564 = vmatpush3.bf16.msra.mxu0 %v683_v2  ;;  %v309_v26 = vld [vmem:[#allocation8 + $0x60] sm:$0xff]  ;;  %v308_v27 = vld [vmem:[#allocation8 + $0x58] sm:$0xff]  ;;  %v307_v28 = vld [vmem:[#allocation8 + $0x50] sm:$0xff] }
  0x3c   :  { %565 = vmatprep.subr.bf16.mxu0 %v820_v0  ;;  %v306_v34 = vld [vmem:[#allocation8 + $0x48] sm:$0xff]  ;;  %v305_v35 = vld [vmem:[#allocation8 + $0x40] sm:$0xff]  ;;  %v304_v36 = vld [vmem:[#allocation8 + $0x38] sm:$0xff]  ;;  %p792_p10 = pnand %p791_p9, %p785_p6 }
  0x3d   :  { %584 = vmatpush3.bf16.msra.mxu1 %v691_v12  ;;  %v303_v37 = vld [vmem:[#allocation8 + $0x30] sm:$0xff]  ;;  %v302_v38 = vld [vmem:[#allocation8 + $0x28] sm:$0xff]  ;;  %v301_v39 = vld [vmem:[#allocation8 + $0x20] sm:$0xff] }
  0x3e   :  { %585 = vmatprep.subr.bf16.mxu1 %v820_v0  ;;  %v300_v40 = vld [vmem:[#allocation8 + $0x18] sm:$0xff]  ;;  %v299_v41 = vld [vmem:[#allocation8 + $0x10] sm:$0xff]  ;;  %v298_v42 = vld [vmem:[#allocation8 + $0x8] sm:$0xff] }
  0x3f   :  { %566 = vmatpush3.bf16.msra.mxu0 %v684_v3  ;;  %v297_v43 = vld [vmem:[#allocation8] sm:$0xff]  ;;  %v507_v58 = vld [vmem:[%s949_s4] ss:$0 sm:$0xff] }
  0x40   :  { %567 = vmatprep.subr.bf16.mxu0 %v820_v0  ;;  %v508_v61 = vld [vmem:[%s950_s5] ss:$0 sm:$0xff] }
  0x41   :  { %586 = vmatpush3.bf16.msra.mxu1 %v692_v13 }
  0x42   :  { %587 = vmatprep.subr.bf16.mxu1 %v820_v0 }
  0x43   :  { %568 = vmatpush3.bf16.msra.mxu0 %v685_v4 }
  0x44   :  { %569 = vmatprep.subr.bf16.mxu0 %v820_v0 }
  0x45   :  { %588 = vmatpush3.bf16.msra.mxu1 %v693_v18 }
  0x46   :  { %589 = vmatprep.subr.bf16.mxu1 %v820_v0 }
  0x47   :  { %570 = vmatpush3.bf16.msra.mxu0 %v686_v5 }
  0x48   :  { %571 = vmatprep.subr.bf16.mxu0 %v820_v0 }
  0x49   :  { %590 = vmatpush3.bf16.msra.mxu1 %v694_v19 }
  0x4a   :  { %591 = vmatprep.subr.bf16.mxu1 %v820_v0 }
  0x4b   :  { %572 = vmatpush3.bf16.msra.mxu0 %v687_v6 }
  0x4c   :  { %573 = vmatprep.subr.bf16.mxu0 %v820_v0 }
  0x4d   :  { %592 = vmatpush3.bf16.msra.mxu1 %v695_v20 }
  0x4e   :  { %593 = vmatprep.subr.bf16.mxu1 %v820_v0 }
  0x4f   :  { %574 = vmatpush3.bf16.msra.mxu0 %v688_v7 }
  0x50   :  { %575 = vmatprep.subr.bf16.mxu0 %v820_v0 }
  0x51   :  { %594 = vmatpush3.bf16.msra.mxu1 %v696_v21 }
  0x52   :  { %595 = vmatprep.subr.bf16.mxu1 %v820_v0 }
  0x53   :  { %576 = vmatpush3.bf16.msra.mxu0 %v689_v8 }
  0x54   :  { %601 = vmatprep.subr.mxu0 %v820_v0 }
  0x55   :  { %596 = vmatpush3.bf16.msra.mxu1 %v697_v22 }
  0x56   :  { %578 = vmatmul.mubr.bf16.vlgmr.msra.gmra.mxu0 %v79_v10  ;;  %636 = vmatprep.subr.mxu1 %v820_v0 }
  0x57   :  { %633 = vmatprep.mubr.msk.f32.mxu0 %vm821_vm0, %v820_v0  ;;  %602 = vmatpush3.msra.mxu0 %v312_v23 }
  0x58   :  { %603 = vmatprep.subr.mxu0 %v820_v0 }
  0x59   :  { %604 = vmatpush3.msra.mxu0 %v311_v24 }
  0x5a   :  { %605 = vmatprep.subr.mxu0 %v820_v0 }
  0x5b   :  { %606 = vmatpush3.msra.mxu0 %v310_v25 }
  0x5c   :  { %607 = vmatprep.subr.mxu0 %v820_v0 }
  0x5d   :  { %608 = vmatpush3.msra.mxu0 %v309_v26 }
  0x5e   :  { %609 = vmatprep.subr.mxu0 %v820_v0 }
  0x5f   :  { %610 = vmatpush3.msra.mxu0 %v308_v27 }
  0x60   :  { %611 = vmatprep.subr.mxu0 %v820_v0 }
  0x61   :  { %612 = vmatpush3.msra.mxu0 %v307_v28 }
  0x62   :  { %613 = vmatprep.subr.mxu0 %v820_v0 }
  0x63   :  { %614 = vmatpush3.msra.mxu0 %v306_v34 }
  0x64   :  { %615 = vmatprep.subr.mxu0 %v820_v0 }
  0x65   :  { %616 = vmatpush3.msra.mxu0 %v305_v35 }
  0x66   :  { %617 = vmatprep.subr.mxu0 %v820_v0 }
  0x67   :  { %618 = vmatpush3.msra.mxu0 %v304_v36 }
  0x68   :  { %619 = vmatprep.subr.mxu0 %v820_v0 }
  0x69   :  { %620 = vmatpush3.msra.mxu0 %v303_v37 }
  0x6a   :  { %621 = vmatprep.subr.mxu0 %v820_v0 }
  0x6b   :  { %622 = vmatpush3.msra.mxu0 %v302_v38 }
  0x6c   :  { %623 = vmatprep.subr.mxu0 %v820_v0 }
  0x6d   :  { %624 = vmatpush3.msra.mxu0 %v301_v39 }
  0x6e   :  { %625 = vmatprep.subr.mxu0 %v820_v0 }
  0x6f   :  { %626 = vmatpush3.msra.mxu0 %v300_v40 }
  0x70   :  { %627 = vmatprep.subr.mxu0 %v820_v0 }
  0x71   :  { %628 = vmatpush3.msra.mxu0 %v299_v41 }
  0x72   :  { %629 = vmatprep.subr.mxu0 %v820_v0 }
  0x73   :  { %630 = vmatpush3.msra.mxu0 %v298_v42 }
  0x74   :  { %631 = vmatprep.subr.mxu0 %v820_v0 }
  0x75   :  { %632 = vmatpush3.msra.mxu0 %v297_v43 }
 0x116   :  { %v178_v14 = vpop.f32.mrf.mxu0 }
 0x117   :  { %184 = vmax.xlane.f32.xlu0 %v178_v14 }
 0x118   :  { %v579_v15 = vpop.f32.mrf.mxu0 }
 0x11a   :  { %v181_v16 = vpop.f32.mrf.mxu0 }
 0x11c   :  { %v580_v17 = vpop.f32.mrf.mxu0 }
 0x1a0   :  { %v185_v29 = vpop.xlane.xlu0 %184 }
 0x1a1   :  { %v186_v30 = vsub.f32 %v178_v14, %v185_v29 }
 0x1a3   :  { %v187_v31 = vmul.f32 1.442695, %v186_v30 }
 0x1a5   :  { %698 = vpow2.f32 %v187_v31 }
 0x1b2   :  { %v904_v32 = vpop.eup %698 }
 0x1b3   :  { %v189_v33 = vpack.c.bf16 %v904_v32, %v904_v32 }
 0x1b5   :  { %598 = vmatmul.mubr.bf16.vlgmr.msra.gmra.mxu1 %v189_v33 }
 0x1b6   :  { %637 = vmatpush3.msra.mxu1 %v312_v23  ;;  %668 = vmatprep.mubr.msk.f32.mxu1 %vm821_vm0, %v820_v0 }
 0x1b7   :  { %638 = vmatprep.subr.mxu1 %v820_v0 }
 0x1b8   :  { %639 = vmatpush3.msra.mxu1 %v311_v24 }
 0x1b9   :  { %640 = vmatprep.subr.mxu1 %v820_v0 }
 0x1ba   :  { %641 = vmatpush3.msra.mxu1 %v310_v25 }
 0x1bb   :  { %642 = vmatprep.subr.mxu1 %v820_v0 }
 0x1bc   :  { %643 = vmatpush3.msra.mxu1 %v309_v26 }
 0x1bd   :  { %644 = vmatprep.subr.mxu1 %v820_v0 }
 0x1be   :  { %645 = vmatpush3.msra.mxu1 %v308_v27 }
 0x1bf   :  { %646 = vmatprep.subr.mxu1 %v820_v0 }
 0x1c0   :  { %647 = vmatpush3.msra.mxu1 %v307_v28 }
 0x1c1   :  { %648 = vmatprep.subr.mxu1 %v820_v0 }
 0x1c2   :  { %649 = vmatpush3.msra.mxu1 %v306_v34 }
 0x1c3   :  { %650 = vmatprep.subr.mxu1 %v820_v0 }
 0x1c4   :  { %651 = vmatpush3.msra.mxu1 %v305_v35 }
 0x1c5   :  { %652 = vmatprep.subr.mxu1 %v820_v0 }
 0x1c6   :  { %653 = vmatpush3.msra.mxu1 %v304_v36 }
 0x1c7   :  { %654 = vmatprep.subr.mxu1 %v820_v0 }
 0x1c8   :  { %655 = vmatpush3.msra.mxu1 %v303_v37 }
 0x1c9   :  { %656 = vmatprep.subr.mxu1 %v820_v0 }
 0x1ca   :  { %657 = vmatpush3.msra.mxu1 %v302_v38 }
 0x1cb   :  { %658 = vmatprep.subr.mxu1 %v820_v0 }
 0x1cc   :  { %659 = vmatpush3.msra.mxu1 %v301_v39 }
 0x1cd   :  { %660 = vmatprep.subr.mxu1 %v820_v0 }
 0x1ce   :  { %661 = vmatpush3.msra.mxu1 %v300_v40 }
 0x1cf   :  { %662 = vmatprep.subr.mxu1 %v820_v0 }
 0x1d0   :  { %663 = vmatpush3.msra.mxu1 %v299_v41 }
 0x1d1   :  { %664 = vmatprep.subr.mxu1 %v820_v0 }
 0x1d2   :  { %665 = vmatpush3.msra.mxu1 %v298_v42 }
 0x1d3   :  { %666 = vmatprep.subr.mxu1 %v820_v0 }
 0x1d4   :  { %667 = vmatpush3.msra.mxu1 %v297_v43 }
 0x275   :  { %v288_v44 = vpop.f32.mrf.mxu1 }
 0x276   :  { %700 = vrcp.f32 %v288_v44 }
 0x277   :  { %v599_v45 = vpop.f32.mrf.mxu1 }
 0x279   :  { %v291_v46 = vpop.f32.mrf.mxu1 }
 0x27b   :  { %v600_v47 = vpop.f32.mrf.mxu1 }
 0x283   :  { %v701_v48 = vpop.eup %700 }
 0x284   :  { %v295_v49 = vmul.f32 %v701_v48, %v904_v32 }
 0x286   :  { %v296_v50 = vadd.f32 %v295_v49, %v882_v9 }
 0x288   :  { %634 = vmatmul.mubr.f32.vlgmr.msra.gmra.mxu0 %v296_v50 }
 0x348   :  { %v379_v51 = vpop.f32.mrf.mxu0 }
 0x349   :  { %v383_v52 = vsub.f32 %v296_v50, %v379_v51 }
 0x34a   :  { %v635_v53 = vpop.f32.mrf.mxu0 }
 0x34b   :  { %v384_v54 = vmul.f32 %v383_v52, %v383_v52 }
 0x34d   :  { %669 = vmatmul.mubr.f32.vlgmr.msra.gmra.mxu1 %v384_v54 }
 0x40d   :  { %v451_v55 = vpop.f32.mrf.mxu1 }
 0x40e   :  { %v452_v56 = vadd.f32 1e-05, %v451_v55 }
 0x40f   :  { %v670_v57 = vpop.f32.mrf.mxu1 }
 0x410   :  { %702 = vrsqrt.f32 %v452_v56 }
 0x41d   :  { %v703_v59 = vpop.eup %702 }
 0x41e   :  { %v463_v60 = vmul.f32 %v703_v59, %v507_v58 }
 0x420   :  { %v464_v62 = vmul.f32 %v463_v60, %v383_v52 }
 0x422   :  { %v472_v63 = vadd.f32 %v508_v61, %v464_v62 }
 0x424   :  { %473 = vst [vmem:[#allocation10] sm:$0xff] %v472_v63 }
 0x425   :  { %795 = shalt.err (!%p792_p10)
}
 0x426   :  { %483 = dma.vmem_to_hbm [thread:$0]  %s481_s22, 128, %s951_s6, [#allocation4]  }
 0x427   :  { %810 = dma.done.wait [#allocation4], 128  }
 0x428   :  { %811 = vsyncadd [#allocation4], 4294967168 }
 0x429   :  { %487 = vsyncpa [#allocation3], 1 }
 0x42a   :  { %488 = vsyncpa [#allocation6], 1 }
 0x42b   :  { %489 = vsyncpa [#allocation9], 1 }
 0x42c   :  { %490 = vsyncpa [#allocation4], 1 }

</bundles_post_ra>
